<compile_context>
chip_gen: v7x
topology: tpu7x:2x2x1
jax: 0.10.0
libtpu: 0.0.40
codegen_flags: <defaults>
</compile_context>

<pallas_src>
import jax
import jax.numpy as jnp
from jax.experimental import pallas as pl
from jax.experimental.pallas import tpu as pltpu


def _round_up(x, m):
    return ((x + m - 1) // m) * m


def _cdiv(a, b):
    return (a + b - 1) // b


# Row-tile cap: with bf16 activations, d_in=1024 and TM=1024 the pipelined
# blocks are ~8 MiB (2 branches x 2 buffers x 2 MiB) + ~1 MiB of f32 output
# blocks + ~0.6 MiB of weights -> well inside the explicit 32 MiB VMEM limit
# on v5e / v6e / v7x.
_TM_CAP = 1024
_VMEM_LIMIT_BYTES = 32 * 1024 * 1024


# ---------------------------------------------------------------------------
# Kernels
# ---------------------------------------------------------------------------
def _siamese_pair_kernel(x1_ref, x2_ref, w1_ref, b1_ref, w2a_ref, w2b_ref,
                         b2_ref, o_ref):
    """One row-tile of both branches; shared weights stay resident in VMEM.

    Output packing: branch-1 embedding occupies lanes [0, d_half) and branch-2
    occupies lanes [d_half, 2*d_half) of a single lane-dense (tm, 2*d_half)
    tile.  w2a / w2b are half-shifted copies of the SAME w2, so the packing is
    done with two full-width MXU matmuls + an add (no masked stores / concats)
    and the HBM writeback contains no zero padding.
    """
    w1 = w1_ref[...]           # bf16, resident
    b1 = b1_ref[...]           # f32

    def hidden(x):
        # Layer 1: bf16 MXU matmul, f32 accumulation; bias + ReLU in f32.
        h = jnp.dot(x, w1, preferred_element_type=jnp.float32)
        h = jnp.maximum(h + b1, 0.0)
        return h.astype(w1.dtype)          # back to bf16 for the second MXU pass

    h1 = hidden(x1_ref[...])
    h2 = hidden(x2_ref[...])

    packed = (jnp.dot(h1, w2a_ref[...], preferred_element_type=jnp.float32)
              + jnp.dot(h2, w2b_ref[...], preferred_element_type=jnp.float32)
              + b2_ref[...])
    o_ref[...] = packed.astype(o_ref.dtype)


def _embed_kernel(x_ref, w1_ref, b1_ref, w2_ref, b2_ref, o_ref):
    """Single-branch embedding (dedicated path for get_embedding)."""
    h = jnp.dot(x_ref[...], w1_ref[...], preferred_element_type=jnp.float32)
    h = jnp.maximum(h + b1_ref[...], 0.0)
    out = jnp.dot(h.astype(w2_ref.dtype), w2_ref[...],
                  preferred_element_type=jnp.float32)
    o_ref[...] = (out + b2_ref[...]).astype(o_ref.dtype)


# ---------------------------------------------------------------------------
# Wrappers
# ---------------------------------------------------------------------------
def _row_tile(batch):
    """Row tile: multiple of 8, <= _TM_CAP, and >= 2 grid steps when possible
    so the 'parallel' row axis shards across v7x's two TensorCores."""
    rows8 = _round_up(batch, 8)
    tm = min(_TM_CAP, rows8)
    if _cdiv(batch, tm) < 2 and rows8 >= 16:
        tm = _round_up(_cdiv(rows8, 2), 8)
    return tm


def _prep_pair_params(params):
    """bf16 weights; build half-shifted copies of w2 for lane-packed outputs."""
    w1, b1, w2, b2 = params
    d_out = w2.shape[1]
    d_half = _round_up(d_out, 64)      # per-branch lane slot
    d_pack = 2 * d_half                # packed output width (multiple of 128)

    w1b = w1.astype(jnp.bfloat16)
    b1f = b1.astype(jnp.float32).reshape(1, -1)

    w2a = jnp.pad(w2, ((0, 0), (0, d_pack - d_out))).astype(jnp.bfloat16)
    w2b = jnp.pad(w2, ((0, 0), (d_half, d_half - d_out))).astype(jnp.bfloat16)

    b2f = b2.astype(jnp.float32).reshape(1, -1)
    b2h = jnp.pad(b2f, ((0, 0), (0, d_half - d_out)))
    b2p = jnp.concatenate([b2h, b2h], axis=1)        # (1, d_pack)
    return w1b, b1f, w2a, w2b, b2p, d_out, d_half, d_pack


def _prep_single_params(params):
    """bf16 weights; pad w2/b2 so the single-branch output tile is 128-lane dense."""
    w1, b1, w2, b2 = params
    d_out = w2.shape[1]
    d_out_p = _round_up(d_out, 128)
    pad = d_out_p - d_out
    w1b = w1.astype(jnp.bfloat16)
    b1f = b1.astype(jnp.float32).reshape(1, -1)
    w2p = jnp.pad(w2, ((0, 0), (0, pad))).astype(jnp.bfloat16)
    b2p = jnp.pad(b2.astype(jnp.float32).reshape(1, -1), ((0, 0), (0, pad)))
    return w1b, b1f, w2p, b2p, d_out, d_out_p


@jax.jit
def siamese_forward(x1, x2, params):
    """Siamese.forward: returns (embed(x1), embed(x2)) with shared weights."""
    w1, b1, w2a, w2b, b2p, d_out, d_half, d_pack = _prep_pair_params(params)
    B = x1.shape[0]
    d_in, d_hid = w1.shape

    # Flatten NCHW -> [B, d_in] (row-major, same as torch .view(B, -1)); cast to
    # bf16 (no-op if the caller already feeds bf16).  No row padding — Pallas
    # handles the ragged last row tile.
    x1f = x1.reshape(B, -1).astype(jnp.bfloat16)
    x2f = x2.reshape(B, -1).astype(jnp.bfloat16)

    tm = _row_tile(B)
    grid = (_cdiv(B, tm),)

    flops = 2 * 2 * B * (d_in * d_hid + d_hid * d_pack)        # 2 branches
    bytes_accessed = (2 * B * d_in * 2                         # x1, x2 (bf16)
                      + (d_in * d_hid + 2 * d_hid * d_pack) * 2  # weights (bf16)
                      + (d_hid + d_pack) * 4                     # biases (f32)
                      + B * d_pack * 4)                          # packed out (f32)

    packed = pl.pallas_call(
        _siamese_pair_kernel,
        out_shape=jax.ShapeDtypeStruct((B, d_pack), jnp.float32),
        grid_spec=pltpu.PrefetchScalarGridSpec(
            num_scalar_prefetch=0,
            grid=grid,
            in_specs=[
                pl.BlockSpec((tm, d_in), lambda i: (i, 0)),        # x1 tile
                pl.BlockSpec((tm, d_in), lambda i: (i, 0)),        # x2 tile
                pl.BlockSpec((d_in, d_hid), lambda i: (0, 0)),     # w1 (resident)
                pl.BlockSpec((1, d_hid), lambda i: (0, 0)),        # b1 (resident)
                pl.BlockSpec((d_hid, d_pack), lambda i: (0, 0)),   # w2a (resident)
                pl.BlockSpec((d_hid, d_pack), lambda i: (0, 0)),   # w2b (resident)
                pl.BlockSpec((1, d_pack), lambda i: (0, 0)),       # b2 packed
            ],
            out_specs=pl.BlockSpec((tm, d_pack), lambda i: (i, 0)),
        ),
        compiler_params=pltpu.CompilerParams(
            dimension_semantics=("parallel",),
            vmem_limit_bytes=_VMEM_LIMIT_BYTES,
        ),
        cost_estimate=pl.CostEstimate(
            flops=flops, transcendentals=0, bytes_accessed=bytes_accessed),
    )(x1f, x2f, w1, b1, w2a, w2b, b2p)

    return packed[:, :d_out], packed[:, d_half:d_half + d_out]


@jax.jit
def get_embedding(x, params):
    """Siamese.get_embedding: dedicated single-branch embedding."""
    w1, b1, w2p, b2p, d_out, d_out_p = _prep_single_params(params)
    B = x.shape[0]
    d_in, d_hid = w1.shape

    xf = x.reshape(B, -1).astype(jnp.bfloat16)

    tm = _row_tile(B)
    grid = (_cdiv(B, tm),)

    flops = 2 * B * (d_in * d_hid + d_hid * d_out_p)
    bytes_accessed = (B * d_in * 2
                      + (d_in * d_hid + d_hid * d_out_p) * 2
                      + (d_hid + d_out_p) * 4
                      + B * d_out_p * 4)

    out = pl.pallas_call(
        _embed_kernel,
        out_shape=jax.ShapeDtypeStruct((B, d_out_p), jnp.float32),
        grid_spec=pltpu.PrefetchScalarGridSpec(
            num_scalar_prefetch=0,
            grid=grid,
            in_specs=[
                pl.BlockSpec((tm, d_in), lambda i: (i, 0)),
                pl.BlockSpec((d_in, d_hid), lambda i: (0, 0)),
                pl.BlockSpec((1, d_hid), lambda i: (0, 0)),
                pl.BlockSpec((d_hid, d_out_p), lambda i: (0, 0)),
                pl.BlockSpec((1, d_out_p), lambda i: (0, 0)),
            ],
            out_specs=pl.BlockSpec((tm, d_out_p), lambda i: (i, 0)),
        ),
        compiler_params=pltpu.CompilerParams(
            dimension_semantics=("parallel",),
            vmem_limit_bytes=_VMEM_LIMIT_BYTES,
        ),
        cost_estimate=pl.CostEstimate(
            flops=flops, transcendentals=0, bytes_accessed=bytes_accessed),
    )(xf, w1, b1, w2p, b2p)

    return out[:, :d_out]


def make_params(d_in, d_hidden, d_out):
    """Deterministic synthetic f32 weights for the embedding net."""
    k = jax.random.PRNGKey(0)
    k1, k2 = jax.random.split(k)
    w1 = (jax.random.normal(k1, (d_in, d_hidden), dtype=jnp.float32)
          * (1.0 / jnp.sqrt(d_in)))
    b1 = jnp.zeros((1, d_hidden), dtype=jnp.float32)
    w2 = (jax.random.normal(k2, (d_hidden, d_out), dtype=jnp.float32)
          * (1.0 / jnp.sqrt(d_hidden)))
    b2 = jnp.zeros((1, d_out), dtype=jnp.float32)
    return w1, b1, w2, b2


if __name__ == "__main__":
    B, C, H, W = 2, 4, 16, 16           # NCHW inputs, like PyTorch
    D_IN = C * H * W                    # 1024
    D_HID = 128
    D_OUT = 64

    key = jax.random.PRNGKey(0)
    kx1, kx2 = jax.random.split(key)
    x1 = jax.random.normal(kx1, (B, C, H, W), dtype=jnp.float32)
    x2 = jax.random.normal(kx2, (B, C, H, W), dtype=jnp.float32)

    params = make_params(D_IN, D_HID, D_OUT)

    out1, out2 = siamese_forward(x1, x2, params)
    emb = get_embedding(x1, params)
    jax.block_until_ready((out1, out2, emb))

    # Reference check in plain f32 JAX.  The kernel uses bf16 activations and
    # weights (f32 accumulation), so tolerances are relaxed to ~1e-2 relative.
    w1, b1, w2, b2 = params

    def ref_embed(x):
        h = jnp.maximum(x.reshape(x.shape[0], -1) @ w1 + b1, 0.0)
        return h @ w2 + b2

    r1, r2 = ref_embed(x1), ref_embed(x2)
    assert out1.shape == (B, D_OUT) and out2.shape == (B, D_OUT)
    assert emb.shape == (B, D_OUT)
    assert jnp.allclose(out1, r1, atol=3e-2, rtol=3e-2)
    assert jnp.allclose(out2, r2, atol=3e-2, rtol=3e-2)
    assert jnp.allclose(emb, r1, atol=3e-2, rtol=3e-2)

    print("KERNEL_OK")
</pallas_src>

<mosaic_0001>
module attributes {stable_mosaic.version = 11 : i64} {
  func.func @_siamese_pair_kernel(%arg0: i32, %arg1: memref<8x1024xbf16, #tpu.memory_space<vmem>>, %arg2: memref<8x1024xbf16, #tpu.memory_space<vmem>>, %arg3: memref<1024x128xbf16, #tpu.memory_space<vmem>>, %arg4: memref<1x128xf32, #tpu.memory_space<vmem>>, %arg5: memref<128x128xbf16, #tpu.memory_space<vmem>>, %arg6: memref<128x128xbf16, #tpu.memory_space<vmem>>, %arg7: memref<1x128xf32, #tpu.memory_space<vmem>>, %arg8: memref<8x128xf32, #tpu.memory_space<vmem>>) attributes {dimension_semantics = [#tpu.dimension_semantics<parallel>], iteration_bounds = array<i64: 1>, scalar_prefetch = 0 : i64, scratch_operands = 0 : i64, tpu.core_type = #tpu.core_type<tc>, window_params = [{transform_indices = @transform_0, window_bounds = array<i64: 8, 1024>}, {transform_indices = @transform_1, window_bounds = array<i64: 8, 1024>}, {pipeline_mode = #tpu.pipeline_mode<synchronous>, transform_indices = @transform_2, window_bounds = array<i64: 1024, 128>}, {pipeline_mode = #tpu.pipeline_mode<synchronous>, transform_indices = @transform_3, window_bounds = array<i64: 1, 128>}, {pipeline_mode = #tpu.pipeline_mode<synchronous>, transform_indices = @transform_4, window_bounds = array<i64: 128, 128>}, {pipeline_mode = #tpu.pipeline_mode<synchronous>, transform_indices = @transform_5, window_bounds = array<i64: 128, 128>}, {pipeline_mode = #tpu.pipeline_mode<synchronous>, transform_indices = @transform_6, window_bounds = array<i64: 1, 128>}, {transform_indices = @transform_7, window_bounds = array<i64: 8, 128>}]} {
    %c0 = arith.constant 0 : index
    %c0_0 = arith.constant 0 : index
    %0 = vector.load %arg3[%c0, %c0_0] : memref<1024x128xbf16, #tpu.memory_space<vmem>>, vector<1024x128xbf16>
    %c0_1 = arith.constant 0 : index
    %c0_2 = arith.constant 0 : index
    %1 = vector.load %arg4[%c0_1, %c0_2] : memref<1x128xf32, #tpu.memory_space<vmem>>, vector<1x128xf32>
    %c0_3 = arith.constant 0 : index
    %c0_4 = arith.constant 0 : index
    %2 = vector.load %arg1[%c0_3, %c0_4] : memref<8x1024xbf16, #tpu.memory_space<vmem>>, vector<8x1024xbf16>
    %cst = arith.constant dense<0.000000e+00> : vector<8x128xf32>
    %3 = tpu.matmul %2, %0, %cst {dimension_numbers = #tpu.dot_dimension_numbers<[1], [0], [0], [1], [0, 0, 1, 1], [], []>} : vector<8x1024xbf16>, vector<1024x128xbf16>, vector<8x128xf32> -> vector<8x128xf32>
    %4 = vector.broadcast %1 : vector<1x128xf32> to vector<8x128xf32>
    %5 = arith.addf %3, %4 : vector<8x128xf32>
    %cst_5 = arith.constant 0.000000e+00 : f32
    %6 = vector.broadcast %cst_5 : f32 to vector<8x128xf32>
    %7 = arith.maximumf %5, %6 : vector<8x128xf32>
    %8 = arith.truncf %7 : vector<8x128xf32> to vector<8x128xbf16>
    %c0_6 = arith.constant 0 : index
    %c0_7 = arith.constant 0 : index
    %9 = vector.load %arg2[%c0_6, %c0_7] : memref<8x1024xbf16, #tpu.memory_space<vmem>>, vector<8x1024xbf16>
    %cst_8 = arith.constant dense<0.000000e+00> : vector<8x128xf32>
    %10 = tpu.matmul %9, %0, %cst_8 {dimension_numbers = #tpu.dot_dimension_numbers<[1], [0], [0], [1], [0, 0, 1, 1], [], []>} : vector<8x1024xbf16>, vector<1024x128xbf16>, vector<8x128xf32> -> vector<8x128xf32>
    %11 = vector.broadcast %1 : vector<1x128xf32> to vector<8x128xf32>
    %12 = arith.addf %10, %11 : vector<8x128xf32>
    %cst_9 = arith.constant 0.000000e+00 : f32
    %13 = vector.broadcast %cst_9 : f32 to vector<8x128xf32>
    %14 = arith.maximumf %12, %13 : vector<8x128xf32>
    %15 = arith.truncf %14 : vector<8x128xf32> to vector<8x128xbf16>
    %c0_10 = arith.constant 0 : index
    %c0_11 = arith.constant 0 : index
    %16 = vector.load %arg5[%c0_10, %c0_11] : memref<128x128xbf16, #tpu.memory_space<vmem>>, vector<128x128xbf16>
    %cst_12 = arith.constant dense<0.000000e+00> : vector<8x128xf32>
    %17 = tpu.matmul %8, %16, %cst_12 {dimension_numbers = #tpu.dot_dimension_numbers<[1], [0], [0], [1], [0, 0, 1, 1], [], []>} : vector<8x128xbf16>, vector<128x128xbf16>, vector<8x128xf32> -> vector<8x128xf32>
    %c0_13 = arith.constant 0 : index
    %c0_14 = arith.constant 0 : index
    %18 = vector.load %arg6[%c0_13, %c0_14] : memref<128x128xbf16, #tpu.memory_space<vmem>>, vector<128x128xbf16>
    %cst_15 = arith.constant dense<0.000000e+00> : vector<8x128xf32>
    %19 = tpu.matmul %15, %18, %cst_15 {dimension_numbers = #tpu.dot_dimension_numbers<[1], [0], [0], [1], [0, 0, 1, 1], [], []>} : vector<8x128xbf16>, vector<128x128xbf16>, vector<8x128xf32> -> vector<8x128xf32>
    %20 = arith.addf %17, %19 : vector<8x128xf32>
    %c0_16 = arith.constant 0 : index
    %c0_17 = arith.constant 0 : index
    %21 = vector.load %arg7[%c0_16, %c0_17] : memref<1x128xf32, #tpu.memory_space<vmem>>, vector<1x128xf32>
    %22 = vector.broadcast %21 : vector<1x128xf32> to vector<8x128xf32>
    %23 = arith.addf %20, %22 : vector<8x128xf32>
    %c0_18 = arith.constant 0 : index
    %c0_19 = arith.constant 0 : index
    %24 = vector.load %arg8[%c0_18, %c0_19] : memref<8x128xf32, #tpu.memory_space<vmem>>, vector<8x128xf32>
    tpu.vector_store %arg8[%c0_18, %c0_19], %23 {strides = array<i32>} : memref<8x128xf32, #tpu.memory_space<vmem>>, vector<8x128xf32>,
    return
  }
  func.func @transform_0(%arg0: i32) -> (i32, i32) {
    %c0_i32 = arith.constant 0 : i32
    %c0_i32_0 = arith.constant 0 : i32
    return %arg0, %c0_i32 : i32, i32
  }
  func.func @transform_1(%arg0: i32) -> (i32, i32) {
    %c0_i32 = arith.constant 0 : i32
    %c0_i32_0 = arith.constant 0 : i32
    return %arg0, %c0_i32 : i32, i32
  }
  func.func @transform_2(%arg0: i32) -> (i32, i32) {
    %c0_i32 = arith.constant 0 : i32
    %c0_i32_0 = arith.constant 0 : i32
    %c0_i32_1 = arith.constant 0 : i32
    return %c0_i32, %c0_i32_0 : i32, i32
  }
  func.func @transform_3(%arg0: i32) -> (i32, i32) {
    %c0_i32 = arith.constant 0 : i32
    %c0_i32_0 = arith.constant 0 : i32
    %c0_i32_1 = arith.constant 0 : i32
    return %c0_i32, %c0_i32_0 : i32, i32
  }
  func.func @transform_4(%arg0: i32) -> (i32, i32) {
    %c0_i32 = arith.constant 0 : i32
    %c0_i32_0 = arith.constant 0 : i32
    %c0_i32_1 = arith.constant 0 : i32
    return %c0_i32, %c0_i32_0 : i32, i32
  }
  func.func @transform_5(%arg0: i32) -> (i32, i32) {
    %c0_i32 = arith.constant 0 : i32
    %c0_i32_0 = arith.constant 0 : i32
    %c0_i32_1 = arith.constant 0 : i32
    return %c0_i32, %c0_i32_0 : i32, i32
  }
  func.func @transform_6(%arg0: i32) -> (i32, i32) {
    %c0_i32 = arith.constant 0 : i32
    %c0_i32_0 = arith.constant 0 : i32
    %c0_i32_1 = arith.constant 0 : i32
    return %c0_i32, %c0_i32_0 : i32, i32
  }
  func.func @transform_7(%arg0: i32) -> (i32, i32) {
    %c0_i32 = arith.constant 0 : i32
    %c0_i32_0 = arith.constant 0 : i32
    return %arg0, %c0_i32 : i32, i32
  }
}

</mosaic_0001>

<bundles_post_ra>
// kernel: siamese_forward.1
= control target key start
LH: loop header
LB: loop body
LE: loop exit
PB: predicated region body
PF: predicated region fallthrough
CT: control target
= control target key end

     0   :  { %v177_v30 = vlaneseq  ;;  %v1705_v35 = vmov 1966171168   ;;  %vm1707_vm0 = vmmov 0   ;;  %s2303_s0 = inlined_call_operand.vmem [shape: bf16[2,1024], index: 0, kind: input, shape index: {}]   ;;  %s2304_s1 = inlined_call_operand.vmem [shape: bf16[2,1024], index: 1, kind: input, shape index: {}]   ;;  %s2305_s2 = inlined_call_operand.vmem [shape: bf16[1024,128], index: 2, kind: input, shape index: {}]   ;;  %s2306_s3 = inlined_call_operand.vmem [shape: f32[1,128], index: 3, kind: input, shape index: {}]   ;;  %s2307_s4 = inlined_call_operand.vmem [shape: bf16[128,128], index: 4, kind: input, shape index: {}]   ;;  %s2308_s5 = inlined_call_operand.vmem [shape: bf16[128,128], index: 5, kind: input, shape index: {}]   ;;  %s2309_s6 = inlined_call_operand.vmem [shape: f32[1,128], index: 6, kind: input, shape index: {}]   ;;  %s2310_s7 = inlined_call_operand.vmem [shape: f32[2,128], index: 7, kind: output, shape index: {}]  }
   0x1   :  { %v1751_v0 = vld [vmem:[%s2305_s2 + $0x40] sm:$0xff]   ;;  %v1774_v4 = vld [vmem:[%s2305_s2 + $0x48] sm:$0xff]   ;;  %v1798_v8 = vld [vmem:[%s2305_s2 + $0x50] sm:$0xff]   ;;  %v175_v36 = vunpack.c.l.s4 %v1705_v35 }
   0x2   :  { %v1756_v1 = vld [vmem:[%s2305_s2 + $0xc0] sm:$0xff]   ;;  %1376 = vmatprep.subr.bf16.mxu0 %v1751_v0  ;;  %v1780_v5 = vld [vmem:[%s2305_s2 + $0xc8] sm:$0xff]   ;;  %v1804_v9 = vld [vmem:[%s2305_s2 + $0xd0] sm:$0xff]   ;;  %v178_v37 = vshrl.u32 %v177_v30, 7 }
   0x3   :  { %v1762_v2 = vld [vmem:[%s2305_s2] sm:$0xff]   ;;  %1398 = vmatprep.subr.bf16.mxu1 %v1756_v1  ;;  %v1786_v6 = vld [vmem:[%s2305_s2 + $0x8] sm:$0xff]   ;;  %v1810_v10 = vld [vmem:[%s2305_s2 + $0x10] sm:$0xff]   ;;  %v176_v40 = vunpack.c.0.s8 %v175_v36 }
   0x4   :  { %v1768_v3 = vld [vmem:[%s2305_s2 + $0x80] sm:$0xff]   ;;  %1377 = vmatpush3.bf16.msra.mxu0 %v1762_v2  ;;  %v1792_v7 = vld [vmem:[%s2305_s2 + $0x88] sm:$0xff]   ;;  %v1816_v11 = vld [vmem:[%s2305_s2 + $0x90] sm:$0xff]  }
   0x5   :  { %1399 = vmatpush3.bf16.msra.mxu1 %v1768_v3  ;;  %1378 = vmatprep.subr.bf16.mxu0 %v1774_v4  ;;  %v1822_v12 = vld [vmem:[%s2305_s2 + $0x58] sm:$0xff]   ;;  %v1846_v16 = vld [vmem:[%s2305_s2 + $0x60] sm:$0xff]   ;;  %v1870_v20 = vld [vmem:[%s2305_s2 + $0x68] sm:$0xff]   ;;  %v1962_v43 = vsub.s32 %v176_v40, %v178_v37 }
   0x6   :  { %1400 = vmatprep.subr.bf16.mxu1 %v1780_v5  ;;  %v1828_v13 = vld [vmem:[%s2305_s2 + $0xd8] sm:$0xff]   ;;  %v1852_v17 = vld [vmem:[%s2305_s2 + $0xe0] sm:$0xff]   ;;  %v1876_v21 = vld [vmem:[%s2305_s2 + $0xe8] sm:$0xff]  }
   0x7   :  { %v1834_v14 = vld [vmem:[%s2305_s2 + $0x18] sm:$0xff]   ;;  %v1858_v18 = vld [vmem:[%s2305_s2 + $0x20] sm:$0xff]   ;;  %v1882_v22 = vld [vmem:[%s2305_s2 + $0x28] sm:$0xff]  }
   0x8   :  { %1379 = vmatpush3.bf16.msra.mxu0 %v1786_v6  ;;  %v1840_v15 = vld [vmem:[%s2305_s2 + $0x98] sm:$0xff]   ;;  %v1864_v19 = vld [vmem:[%s2305_s2 + $0xa0] sm:$0xff]   ;;  %v1888_v23 = vld [vmem:[%s2305_s2 + $0xa8] sm:$0xff]  }
   0x9   :  { %1401 = vmatpush3.bf16.msra.mxu1 %v1792_v7  ;;  %1380 = vmatprep.subr.bf16.mxu0 %v1798_v8  ;;  %v1894_v24 = vld [vmem:[%s2305_s2 + $0x70] sm:$0xff]   ;;  %v1918_v28 = vld [vmem:[%s2305_s2 + $0x78] sm:$0xff]   ;;  %v1645_v33 = vld [vmem:[%s2303_s0] ss:$8 sps:$4 sm:$0xff]  }
   0xa   :  { %1402 = vmatprep.subr.bf16.mxu1 %v1804_v9  ;;  %v1900_v25 = vld [vmem:[%s2305_s2 + $0xf0] sm:$0xff]   ;;  %v1924_v29 = vld [vmem:[%s2305_s2 + $0xf8] sm:$0xff]   ;;  %v1647_v34 = vld [vmem:[%s2303_s0 + $0x4] ss:$8 sps:$4 sm:$0xff]   ;;  %v180_v44 = vrot.slane %v1645_v33, %v1962_v43 }
   0xb   :  { %v1906_v26 = vld [vmem:[%s2305_s2 + $0x30] sm:$0xff]   ;;  %v1930_v31 = vld [vmem:[%s2305_s2 + $0x38] sm:$0xff]   ;;  %v1955_v41 = vld [vmem:[%s2305_s2 + $0x140] sm:$0xff]   ;;  %v1969_v46 = vrot.slane %v1647_v34, %v1962_v43 }
   0xc   :  { %1381 = vmatpush3.bf16.msra.mxu0 %v1810_v10  ;;  %v1912_v27 = vld [vmem:[%s2305_s2 + $0xb0] sm:$0xff]   ;;  %v1936_v32 = vld [vmem:[%s2305_s2 + $0xb8] sm:$0xff]   ;;  %v1960_v42 = vld [vmem:[%s2305_s2 + $0x1c0] sm:$0xff]  }
   0xd   :  { %1403 = vmatpush3.bf16.msra.mxu1 %v1816_v11  ;;  %1382 = vmatprep.subr.bf16.mxu0 %v1822_v12  ;;  %v1648_v38 = vld [vmem:[%s2303_s0 + $0x10] ss:$8 sps:$4 sm:$0xff]   ;;  %v1650_v39 = vld [vmem:[%s2303_s0 + $0x14] ss:$8 sps:$4 sm:$0xff]   ;;  %v1979_v51 = vld [vmem:[%s2305_s2 + $0x100] sm:$0xff]  }
   0xe   :  { %1404 = vmatprep.subr.bf16.mxu1 %v1828_v13  ;;  %v194_v45 = vrot.slane %v1648_v38, %v1962_v43  ;;  %v1972_v47 = vrot.slane %v1650_v39, %v1962_v43  ;;  %v1986_v54 = vld [vmem:[%s2305_s2 + $0x180] sm:$0xff]   ;;  %v1992_v56 = vld [vmem:[%s2305_s2 + $0x148] sm:$0xff]   ;;  %v2014_v63 = vld [vmem:[%s2305_s2 + $0x150] sm:$0xff]  }
   0xf   :  { %v1997_v59 = vld [vmem:[%s2305_s2 + $0x1c8] sm:$0xff]   ;;  %v2020_v30 = vld [vmem:[%s2305_s2 + $0x1d0] sm:$0xff]   ;;  %v2038_v35 = vld [vmem:[%s2305_s2 + $0x158] sm:$0xff]  }
  0x10   :  { %1383 = vmatpush3.bf16.msra.mxu0 %v1834_v14  ;;  %v203_v48 = vcombine.high %v180_v44, %v194_v45  ;;  %v202_v49 = vcombine.low %v180_v44, %v194_v45  ;;  %v205_v50 = vcombine.high %v1969_v46, %v1972_v47  ;;  %v2002_v60 = vld [vmem:[%s2305_s2 + $0x108] sm:$0xff]   ;;  %v2026_v33 = vld [vmem:[%s2305_s2 + $0x110] sm:$0xff]   ;;  %v2044_v36 = vld [vmem:[%s2305_s2 + $0x1d8] sm:$0xff]  }
  0x11   :  { %1405 = vmatpush3.bf16.msra.mxu1 %v1840_v15  ;;  %1384 = vmatprep.subr.bf16.mxu0 %v1846_v16  ;;  %v2008_v62 = vld [vmem:[%s2305_s2 + $0x188] sm:$0xff]   ;;  %v2032_v34 = vld [vmem:[%s2305_s2 + $0x190] sm:$0xff]   ;;  %v2050_v37 = vld [vmem:[%s2305_s2 + $0x118] sm:$0xff]  }
  0x12   :  { %1406 = vmatprep.subr.bf16.mxu1 %v1852_v17  ;;  %v226_v52 = vrot.slane %v203_v48, %v1962_v43  ;;  %v212_v53 = vrot.slane %v202_v49, %v1962_v43  ;;  %v233_v55 = vrot.slane %v205_v50, %v1962_v43  ;;  %v2056_v38 = vld [vmem:[%s2305_s2 + $0x198] sm:$0xff]   ;;  %v2062_v39 = vld [vmem:[%s2305_s2 + $0x160] sm:$0xff]   ;;  %v2086_v48 = vld [vmem:[%s2305_s2 + $0x168] sm:$0xff]  }
  0x13   :  { %v2068_v40 = vld [vmem:[%s2305_s2 + $0x1e0] sm:$0xff]   ;;  %2323 = vst [vmem:[#allocation6_spill] sm:$0xff] %v2086_v48  ;;  %v2092_v49 = vld [vmem:[%s2305_s2 + $0x1e8] sm:$0xff]  }
  0x14   :  { %1385 = vmatpush3.bf16.msra.mxu0 %v1858_v18  ;;  %662 = vmatprep.mubr.bf16.mxu0 %v226_v52  ;;  %v236_v57 = vcombine.high %v226_v52, %v226_v52  ;;  %v234_v58 = vcombine.high %v212_v53, %v212_v53  ;;  %v237_v61 = vcombine.high %v233_v55, %v233_v55  ;;  %v2074_v44 = vld [vmem:[%s2305_s2 + $0x120] sm:$0xff]   ;;  %v2098_v50 = vld [vmem:[%s2305_s2 + $0x128] sm:$0xff]  }
  0x15   :  { %1407 = vmatpush3.bf16.msra.mxu1 %v1864_v19  ;;  %1386 = vmatprep.subr.bf16.mxu0 %v1870_v20  ;;  %2320 = vst [vmem:[#allocation3_spill] sm:$0xff] %v2068_v40  ;;  %2321 = vst [vmem:[#allocation4_spill] sm:$0xff] %v2074_v44  ;;  %v2080_v45 = vld [vmem:[%s2305_s2 + $0x1a0] sm:$0xff]   ;;  %v2104_v52 = vld [vmem:[%s2305_s2 + $0x1a8] sm:$0xff]  }
  0x16   :  { %1408 = vmatprep.subr.bf16.mxu1 %v1876_v21  ;;  %702 = vmatprep.mubr.bf16.mxu1 %v236_v57  ;;  %2322 = vst [vmem:[#allocation5_spill] sm:$0xff] %v2080_v45  ;;  %2324 = vst [vmem:[#allocation7_spill] sm:$0xff] %v2092_v49  ;;  %v2121_v57 = vld [vmem:[%s2305_s2 + $0x130] sm:$0xff]  }
  0x17   :  { %2325 = vst [vmem:[#allocation8_spill] sm:$0xff] %v2098_v50  ;;  %2326 = vst [vmem:[#allocation9_spill] sm:$0xff] %v2104_v52 }
  0x18   :  { %1387 = vmatpush3.bf16.msra.mxu0 %v1882_v22  ;;  %2328 = vst [vmem:[#allocation11_spill] sm:$0xff] %v2121_v57 }
  0x19   :  { %1409 = vmatpush3.bf16.msra.mxu1 %v1888_v23  ;;  %1388 = vmatprep.subr.bf16.mxu0 %v1894_v24 }
  0x1a   :  { %1410 = vmatprep.subr.bf16.mxu1 %v1900_v25 }
  0x1c   :  { %1389 = vmatpush3.bf16.msra.mxu0 %v1906_v26 }
  0x1d   :  { %1411 = vmatpush3.bf16.msra.mxu1 %v1912_v27  ;;  %1390 = vmatprep.subr.bf16.mxu0 %v1918_v28 }
  0x1e   :  { %1412 = vmatprep.subr.bf16.mxu1 %v1924_v29 }
  0x20   :  { %1391 = vmatpush3.bf16.msra.mxu0 %v1930_v31 }
  0x21   :  { %1413 = vmatpush3.bf16.msra.mxu1 %v1936_v32  ;;  %1420 = vmatprep.subr.bf16.mxu0 %v1955_v41 }
  0x22   :  { %1442 = vmatprep.subr.bf16.mxu1 %v1960_v42 }
  0x23   :  { %663 = vmatmul.mubr.bf16.vlgmr.msra.gmra.mrb[0].mxu0 %v212_v53  ;;  %v2109_v53 = vld [vmem:[%s2305_s2 + $0x170] sm:$0xff]  }
  0x24   :  { %1421 = vmatpush3.bf16.msra.mxu0 %v1979_v51  ;;  %703 = vmatmul.mubr.bf16.vlgmr.msra.gmra.mrb[0].mxu1 %v234_v58  ;;  %2327 = vst [vmem:[#allocation10_spill] sm:$0xff] %v2109_v53  ;;  %v2127_v58 = vld [vmem:[%s2305_s2 + $0x178] sm:$0xff]  }
  0x25   :  { %1422 = vmatprep.subr.bf16.mxu0 %v1992_v56  ;;  %1443 = vmatpush3.bf16.msra.mxu1 %v1986_v54 }
  0x26   :  { %742 = vmatprep.mubr.bf16.mxu0 %v233_v55  ;;  %1444 = vmatprep.subr.bf16.mxu1 %v1997_v59  ;;  %v2115_v55 = vld [vmem:[%s2305_s2 + $0x1f0] sm:$0xff]  }
  0x27   :  { %782 = vmatprep.mubr.bf16.mxu1 %v237_v61  ;;  %v2133_v61 = vld [vmem:[%s2305_s2 + $0x1b0] sm:$0xff]  }
  0x28   :  { %1423 = vmatpush3.bf16.msra.mxu0 %v2002_v60 }
  0x29   :  { %1424 = vmatprep.subr.bf16.mxu0 %v2014_v63  ;;  %1445 = vmatpush3.bf16.msra.mxu1 %v2008_v62 }
  0x2a   :  { %1446 = vmatprep.subr.bf16.mxu1 %v2020_v30 }
  0x2c   :  { %1425 = vmatpush3.bf16.msra.mxu0 %v2026_v33 }
  0x2d   :  { %1426 = vmatprep.subr.bf16.mxu0 %v2038_v35  ;;  %1447 = vmatpush3.bf16.msra.mxu1 %v2032_v34 }
  0x2e   :  { %1448 = vmatprep.subr.bf16.mxu1 %v2044_v36 }
  0x30   :  { %1427 = vmatpush3.bf16.msra.mxu0 %v2050_v37 }
  0x31   :  { %1428 = vmatprep.subr.bf16.mxu0 %v2062_v39  ;;  %1449 = vmatpush3.bf16.msra.mxu1 %v2056_v38 }
  0x32   :  { %1450 = vmatprep.subr.bf16.mxu1 %v2068_v40 }
  0x34   :  { %1429 = vmatpush3.bf16.msra.mxu0 %v2074_v44 }
  0x35   :  { %1430 = vmatprep.subr.bf16.mxu0 %v2086_v48  ;;  %1451 = vmatpush3.bf16.msra.mxu1 %v2080_v45  ;;  %v2139_v45 = vld [vmem:[%s2305_s2 + $0x1f8] sm:$0xff]   ;;  %v1683_v48 = vld [vmem:[%s2304_s1] ss:$8 sps:$4 sm:$0xff]  }
  0x36   :  { %1452 = vmatprep.subr.bf16.mxu1 %v2092_v49  ;;  %v204_v49 = vcombine.low %v1969_v46, %v1972_v47  ;;  %v810_v44 = vrot.slane %v1683_v48, %v1962_v43  ;;  %v2162_v47 = vld [vmem:[%s2305_s2 + $0x1b8] sm:$0xff]  }
  0x38   :  { %1431 = vmatpush3.bf16.msra.mxu0 %v2098_v50  ;;  %v1685_v50 = vld [vmem:[%s2304_s1 + $0x10] ss:$8 sps:$4 sm:$0xff]  }
  0x39   :  { %1432 = vmatprep.subr.bf16.mxu0 %v2109_v53  ;;  %1453 = vmatpush3.bf16.msra.mxu1 %v2104_v52  ;;  %v2153_v53 = vld [vmem:[%s2305_s2 + $0x138] sm:$0xff]   ;;  %v824_v46 = vrot.slane %v1685_v50, %v1962_v43  ;;  %v219_v52 = vrot.slane %v204_v49, %v1962_v43 }
  0x3a   :  { %1454 = vmatprep.subr.bf16.mxu1 %v2115_v55 }
  0x3b   :  { %v833_v40 = vcombine.high %v810_v44, %v824_v46  ;;  %v235_v50 = vcombine.high %v219_v52, %v219_v52 }
  0x3c   :  { %1433 = vmatpush3.bf16.msra.mxu0 %v2121_v57 }
  0x3d   :  { %1434 = vmatprep.subr.bf16.mxu0 %v2127_v58  ;;  %1455 = vmatpush3.bf16.msra.mxu1 %v2133_v61  ;;  %v856_v48 = vrot.slane %v833_v40, %v1962_v43 }
  0x3e   :  { %1456 = vmatprep.subr.bf16.mxu1 %v2139_v45 }
  0x3f   :  { %v866_v57 = vcombine.high %v856_v48, %v856_v48 }
  0x40   :  { %1435 = vmatpush3.bf16.msra.mxu0 %v2153_v53 }
  0x41   :  { %1464 = vmatprep.subr.bf16.mxu0 %v1751_v0  ;;  %1457 = vmatpush3.bf16.msra.mxu1 %v2162_v47  ;;  %v1687_v0 = vld [vmem:[%s2304_s1 + $0x4] ss:$8 sps:$4 sm:$0xff]  }
  0x42   :  { %1486 = vmatprep.subr.bf16.mxu1 %v1756_v1  ;;  %v1688_v1 = vld [vmem:[%s2304_s1 + $0x14] ss:$8 sps:$4 sm:$0xff]  }
  0x43   :  { %743 = vmatmul.mubr.bf16.vlgmr.msra.gmra.mrb[4].mxu0 %v219_v52 }
  0x44   :  { %1465 = vmatpush3.bf16.msra.mxu0 %v1762_v2  ;;  %908 = vmatprep.mubr.bf16.mxu0 %v856_v48  ;;  %v817_v2 = vrot.slane %v1687_v0, %v1962_v43 }
  0x45   :  { %783 = vmatmul.mubr.bf16.vlgmr.msra.gmra.mrb[4].mxu1 %v235_v50  ;;  %1466 = vmatprep.subr.bf16.mxu0 %v1774_v4  ;;  %v832_v4 = vcombine.low %v810_v44, %v824_v46 }
  0x46   :  { %1487 = vmatpush3.bf16.msra.mxu1 %v1768_v3  ;;  %948 = vmatprep.mubr.bf16.mxu1 %v866_v57  ;;  %v831_v3 = vrot.slane %v1688_v1, %v1962_v43 }
  0x47   :  { %1488 = vmatprep.subr.bf16.mxu1 %v1780_v5 }
  0x48   :  { %1467 = vmatpush3.bf16.msra.mxu0 %v1786_v6  ;;  %v835_v5 = vcombine.high %v817_v2, %v831_v3  ;;  %v842_v6 = vrot.slane %v832_v4, %v1962_v43 }
  0x49   :  { %1468 = vmatprep.subr.bf16.mxu0 %v1798_v8 }
  0x4a   :  { %1489 = vmatpush3.bf16.msra.mxu1 %v1792_v7  ;;  %v863_v7 = vrot.slane %v835_v5, %v1962_v43  ;;  %v864_v8 = vcombine.high %v842_v6, %v842_v6 }
  0x4b   :  { %1490 = vmatprep.subr.bf16.mxu1 %v1804_v9 }
  0x4c   :  { %1469 = vmatpush3.bf16.msra.mxu0 %v1810_v10  ;;  %v867_v9 = vcombine.high %v863_v7, %v863_v7  ;;  %v2329_v10 = vld [vmem:[#allocation3_spill] sm:$0xff] }
  0x4d   :  { %1470 = vmatprep.subr.bf16.mxu0 %v1822_v12  ;;  %v2331_v12 = vld [vmem:[#allocation6_spill] sm:$0xff] }
  0x4e   :  { %1491 = vmatpush3.bf16.msra.mxu1 %v1816_v11  ;;  %v2330_v11 = vld [vmem:[#allocation4_spill] sm:$0xff] }
  0x4f   :  { %1492 = vmatprep.subr.bf16.mxu1 %v1828_v13  ;;  %v2332_v13 = vld [vmem:[#allocation5_spill] sm:$0xff] }
  0x50   :  { %1471 = vmatpush3.bf16.msra.mxu0 %v1834_v14  ;;  %v2333_v14 = vld [vmem:[#allocation7_spill] sm:$0xff] }
  0x51   :  { %1472 = vmatprep.subr.bf16.mxu0 %v1846_v16  ;;  %v2335_v16 = vld [vmem:[#allocation10_spill] sm:$0xff] }
  0x52   :  { %1493 = vmatpush3.bf16.msra.mxu1 %v1840_v15  ;;  %v2334_v15 = vld [vmem:[#allocation8_spill] sm:$0xff] }
  0x53   :  { %1494 = vmatprep.subr.bf16.mxu1 %v1852_v17  ;;  %v834_v17 = vcombine.low %v817_v2, %v831_v3 }
  0x54   :  { %1473 = vmatpush3.bf16.msra.mxu0 %v1858_v18  ;;  %v2336_v18 = vld [vmem:[#allocation9_spill] sm:$0xff] }
  0x55   :  { %1474 = vmatprep.subr.bf16.mxu0 %v1870_v20  ;;  %v849_v20 = vrot.slane %v834_v17, %v1962_v43  ;;  %v1700_v43 = vld [vmem:[%s2308_s5 + $0x18] sm:$0xff]  }
  0x56   :  { %1495 = vmatpush3.bf16.msra.mxu1 %v1864_v19  ;;  %v2337_v19 = vld [vmem:[#allocation11_spill] sm:$0xff] }
  0x57   :  { %1496 = vmatprep.subr.bf16.mxu1 %v1876_v21  ;;  %v865_v21 = vcombine.high %v849_v20, %v849_v20 }
  0x58   :  { %1475 = vmatpush3.bf16.msra.mxu0 %v1882_v22  ;;  %v1706_v22 = vmov 0.0  }
  0x59   :  { %1476 = vmatprep.subr.bf16.mxu0 %v1894_v24  ;;  %v1690_v24 = vld [vmem:[%s2307_s4 + $0x8] sm:$0xff]  }
  0x5a   :  { %1497 = vmatpush3.bf16.msra.mxu1 %v1888_v23  ;;  %v1689_v23 = vld [vmem:[%s2307_s4] sm:$0xff]  }
  0x5b   :  { %1498 = vmatprep.subr.bf16.mxu1 %v1900_v25  ;;  %v1691_v25 = vld [vmem:[%s2307_s4 + $0x10] sm:$0xff]  }
  0x5c   :  { %1477 = vmatpush3.bf16.msra.mxu0 %v1906_v26  ;;  %v1692_v26 = vld [vmem:[%s2307_s4 + $0x18] sm:$0xff]  }
  0x5d   :  { %1478 = vmatprep.subr.bf16.mxu0 %v1918_v28  ;;  %v1694_v28 = vld [vmem:[%s2307_s4 + $0x28] sm:$0xff]  }
  0x5e   :  { %1499 = vmatpush3.bf16.msra.mxu1 %v1912_v27  ;;  %v1693_v27 = vld [vmem:[%s2307_s4 + $0x20] sm:$0xff]  }
  0x5f   :  { %1500 = vmatprep.subr.bf16.mxu1 %v1924_v29  ;;  %v1695_v29 = vld [vmem:[%s2307_s4 + $0x30] sm:$0xff]  }
  0x60   :  { %1479 = vmatpush3.bf16.msra.mxu0 %v1930_v31  ;;  %v1696_v31 = vld [vmem:[%s2307_s4 + $0x38] sm:$0xff]  }
  0x61   :  { %1508 = vmatprep.subr.bf16.mxu0 %v1955_v41  ;;  %v1698_v41 = vld [vmem:[%s2308_s5 + $0x8] sm:$0xff]  }
  0x62   :  { %1501 = vmatpush3.bf16.msra.mxu1 %v1936_v32  ;;  %v1697_v32 = vld [vmem:[%s2308_s5] sm:$0xff]  }
  0x63   :  { %909 = vmatmul.mubr.bf16.vlgmr.msra.gmra.mrb[8].mxu0 %v842_v6  ;;  %1530 = vmatprep.subr.bf16.mxu1 %v1960_v42  ;;  %v1699_v42 = vld [vmem:[%s2308_s5 + $0x10] sm:$0xff]  }
  0x64   :  { %1509 = vmatpush3.bf16.msra.mxu0 %v1979_v51  ;;  %988 = vmatprep.mubr.bf16.mxu0 %v863_v7  ;;  %v1701_v51 = vld [vmem:[%s2308_s5 + $0x20] sm:$0xff]  }
  0x65   :  { %949 = vmatmul.mubr.bf16.vlgmr.msra.gmra.mrb[8].mxu1 %v864_v8  ;;  %1510 = vmatprep.subr.bf16.mxu0 %v1992_v56  ;;  %v1703_v56 = vld [vmem:[%s2308_s5 + $0x30] sm:$0xff]  }
  0x66   :  { %1531 = vmatpush3.bf16.msra.mxu1 %v1986_v54  ;;  %1028 = vmatprep.mubr.bf16.mxu1 %v867_v9  ;;  %v1702_v54 = vld [vmem:[%s2308_s5 + $0x28] sm:$0xff]  }
  0x67   :  { %1532 = vmatprep.subr.bf16.mxu1 %v1997_v59  ;;  %v1704_v59 = vld [vmem:[%s2308_s5 + $0x38] sm:$0xff]  }
  0x68   :  { %1511 = vmatpush3.bf16.msra.mxu0 %v2002_v60 }
  0x69   :  { %1512 = vmatprep.subr.bf16.mxu0 %v2014_v63 }
  0x6a   :  { %1533 = vmatpush3.bf16.msra.mxu1 %v2008_v62  ;;  %v1294_v62 = vld [vmem:[%s2306_s3] ss:$0 sm:$0xff] }
  0x6b   :  { %1534 = vmatprep.subr.bf16.mxu1 %v2020_v30 }
  0x6c   :  { %1513 = vmatpush3.bf16.msra.mxu0 %v2026_v33 }
  0x6d   :  { %1514 = vmatprep.subr.bf16.mxu0 %v2038_v35 }
  0x6e   :  { %1535 = vmatpush3.bf16.msra.mxu1 %v2032_v34 }
  0x6f   :  { %1536 = vmatprep.subr.bf16.mxu1 %v2044_v36 }
  0x70   :  { %1515 = vmatpush3.bf16.msra.mxu0 %v2050_v37 }
  0x71   :  { %1516 = vmatprep.subr.bf16.mxu0 %v2062_v39 }
  0x72   :  { %1537 = vmatpush3.bf16.msra.mxu1 %v2056_v38 }
  0x73   :  { %1538 = vmatprep.subr.bf16.mxu1 %v2329_v10 }
  0x74   :  { %1517 = vmatpush3.bf16.msra.mxu0 %v2330_v11 }
  0x75   :  { %1518 = vmatprep.subr.bf16.mxu0 %v2331_v12 }
  0x76   :  { %1539 = vmatpush3.bf16.msra.mxu1 %v2332_v13 }
  0x77   :  { %1540 = vmatprep.subr.bf16.mxu1 %v2333_v14 }
  0x78   :  { %1519 = vmatpush3.bf16.msra.mxu0 %v2334_v15 }
  0x79   :  { %1520 = vmatprep.subr.bf16.mxu0 %v2335_v16 }
  0x7a   :  { %1541 = vmatpush3.bf16.msra.mxu1 %v2336_v18 }
  0x7b   :  { %1542 = vmatprep.subr.bf16.mxu1 %v2115_v55 }
  0x7c   :  { %1521 = vmatpush3.bf16.msra.mxu0 %v2337_v19 }
  0x7d   :  { %1522 = vmatprep.subr.bf16.mxu0 %v2127_v58 }
  0x7e   :  { %1543 = vmatpush3.bf16.msra.mxu1 %v2133_v61 }
  0x7f   :  { %1544 = vmatprep.subr.bf16.mxu1 %v2139_v45 }
  0x80   :  { %1523 = vmatpush3.bf16.msra.mxu0 %v2153_v53 }
  0x81   :  { %1570 = vmatprep.subr.bf16.mxu0 %v1706_v22 }
  0x82   :  { %1545 = vmatpush3.bf16.msra.mxu1 %v2162_v47 }
  0x83   :  { %989 = vmatmul.mubr.bf16.vlgmr.msra.gmra.mrb[12].mxu0 %v849_v20  ;;  %1590 = vmatprep.subr.bf16.mxu1 %v1706_v22 }
  0x84   :  { %1586 = vmatprep.mubr.msk.bf16.mxu0 %vm1707_vm0, %v1706_v22  ;;  %1571 = vmatpush3.bf16.msra.mxu0 %v1697_v32 }
  0x85   :  { %1029 = vmatmul.mubr.bf16.vlgmr.msra.gmra.mrb[12].mxu1 %v865_v21  ;;  %1572 = vmatprep.subr.bf16.mxu0 %v1706_v22 }
  0x86   :  { %1591 = vmatpush3.bf16.msra.mxu1 %v1689_v23  ;;  %1606 = vmatprep.mubr.msk.bf16.mxu1 %vm1707_vm0, %v1706_v22 }
  0x87   :  { %1592 = vmatprep.subr.bf16.mxu1 %v1706_v22 }
  0x88   :  { %1573 = vmatpush3.bf16.msra.mxu0 %v1698_v41 }
  0x89   :  { %1574 = vmatprep.subr.bf16.mxu0 %v1706_v22 }
  0x8a   :  { %1593 = vmatpush3.bf16.msra.mxu1 %v1690_v24 }
  0x8b   :  { %1594 = vmatprep.subr.bf16.mxu1 %v1706_v22 }
  0x8c   :  { %1575 = vmatpush3.bf16.msra.mxu0 %v1699_v42  ;;  %v1375_v42 = vld [vmem:[%s2309_s6] ss:$0 sm:$0xff] }
  0x8d   :  { %1576 = vmatprep.subr.bf16.mxu0 %v1706_v22 }
  0x8e   :  { %1595 = vmatpush3.bf16.msra.mxu1 %v1691_v25 }
  0x8f   :  { %1596 = vmatprep.subr.bf16.mxu1 %v1706_v22 }
  0x90   :  { %1577 = vmatpush3.bf16.msra.mxu0 %v1700_v43 }
  0x91   :  { %1578 = vmatprep.subr.bf16.mxu0 %v1706_v22 }
  0x92   :  { %1597 = vmatpush3.bf16.msra.mxu1 %v1692_v26 }
  0x93   :  { %1598 = vmatprep.subr.bf16.mxu1 %v1706_v22 }
  0x94   :  { %1579 = vmatpush3.bf16.msra.mxu0 %v1701_v51 }
  0x95   :  { %1580 = vmatprep.subr.bf16.mxu0 %v1706_v22 }
  0x96   :  { %1599 = vmatpush3.bf16.msra.mxu1 %v1693_v27 }
  0x97   :  { %1600 = vmatprep.subr.bf16.mxu1 %v1706_v22 }
  0x98   :  { %1581 = vmatpush3.bf16.msra.mxu0 %v1702_v54 }
  0x99   :  { %1582 = vmatprep.subr.bf16.mxu0 %v1706_v22 }
  0x9a   :  { %1601 = vmatpush3.bf16.msra.mxu1 %v1694_v28 }
  0x9b   :  { %1602 = vmatprep.subr.bf16.mxu1 %v1706_v22 }
  0x9c   :  { %1583 = vmatpush3.bf16.msra.mxu0 %v1703_v56 }
  0x9d   :  { %1584 = vmatprep.subr.bf16.mxu0 %v1706_v22 }
  0x9e   :  { %1603 = vmatpush3.bf16.msra.mxu1 %v1695_v29 }
  0x9f   :  { %1604 = vmatprep.subr.bf16.mxu1 %v1706_v22 }
  0xa0   :  { %1585 = vmatpush3.bf16.msra.mxu0 %v1704_v59 }
  0xa2   :  { %1605 = vmatpush3.bf16.msra.mxu1 %v1696_v31 }
  0xf6   :  { %v1392_v60 = vpop.f32.mrb[0].mxu0 }
  0xf7   :  { %v1393_v63 = vpop.f32.mrb[1].mxu0  ;;  %v1414_v30 = vpop.f32.mrb[0].mxu1 }
  0xf8   :  { %v1394_v33 = vadd.f32 %v1393_v63, %v1392_v60  ;;  %v1395_v34 = vpop.f32.mrb[2].mxu0  ;;  %v1415_v35 = vpop.f32.mrb[1].mxu1 }
  0xf9   :  { %v1396_v36 = vpop.f32.mrb[3].mxu0  ;;  %v1416_v38 = vadd.f32 %v1415_v35, %v1414_v30  ;;  %v1417_v39 = vpop.f32.mrb[2].mxu1 }
  0xfa   :  { %v665_v37 = vadd.f32 %v1394_v33, %v1294_v62  ;;  %v1418_v40 = vpop.f32.mrb[3].mxu1 }
  0xfc   :  { %v705_v44 = vadd.f32 %v1416_v38, %v665_v37 }
 0x116   :  { %v1436_v45 = vpop.f32.mrb[4].mxu0 }
 0x117   :  { %v1437_v49 = vpop.f32.mrb[5].mxu0 }
 0x118   :  { %v1458_v52 = vpop.f32.mrb[4].mxu1  ;;  %v1438_v53 = vadd.f32 %v1437_v49, %v1436_v45  ;;  %v1439_v55 = vpop.f32.mrb[6].mxu0 }
 0x119   :  { %v1459_v57 = vpop.f32.mrb[5].mxu1  ;;  %v1440_v58 = vpop.f32.mrb[7].mxu0 }
 0x11a   :  { %v745_v61 = vadd.f32 %v1438_v53, %v705_v44  ;;  %v1460_v46 = vadd.f32 %v1459_v57, %v1458_v52  ;;  %v1461_v47 = vpop.f32.mrb[6].mxu1 }
 0x11b   :  { %v1462_v48 = vpop.f32.mrb[7].mxu1 }
 0x11c   :  { %v785_v50 = vadd.f32 %v1460_v46, %v745_v61 }
 0x11e   :  { %v790_v0 = vmax.f32 %v785_v50, 0.0 }
 0x120   :  { %v791_v1 = vpack.c.bf16 %v790_v0, %v790_v0 }
 0x122   :  { %1607 = vmatmul.mubr.bf16.vlgmr.msra.gmra.mrb[16].mxu1 %v791_v1 }
 0x136   :  { %v1480_v2 = vpop.f32.mrb[8].mxu0 }
 0x137   :  { %v1481_v3 = vpop.f32.mrb[9].mxu0 }
 0x138   :  { %v1502_v4 = vpop.f32.mrb[8].mxu1  ;;  %v1482_v5 = vadd.f32 %v1481_v3, %v1480_v2  ;;  %v1483_v6 = vpop.f32.mrb[10].mxu0 }
 0x139   :  { %v1503_v7 = vpop.f32.mrb[9].mxu1  ;;  %v1484_v8 = vpop.f32.mrb[11].mxu0 }
 0x13a   :  { %v911_v9 = vadd.f32 %v1482_v5, %v1294_v62  ;;  %v1504_v10 = vadd.f32 %v1503_v7, %v1502_v4  ;;  %v1505_v11 = vpop.f32.mrb[10].mxu1 }
 0x13b   :  { %v1506_v12 = vpop.f32.mrb[11].mxu1 }
 0x13c   :  { %v951_v13 = vadd.f32 %v1504_v10, %v911_v9 }
 0x156   :  { %v1524_v14 = vpop.f32.mrb[12].mxu0 }
 0x157   :  { %v1525_v15 = vpop.f32.mrb[13].mxu0 }
 0x158   :  { %v1546_v16 = vpop.f32.mrb[12].mxu1  ;;  %v1526_v17 = vadd.f32 %v1525_v15, %v1524_v14  ;;  %v1527_v18 = vpop.f32.mrb[14].mxu0 }
 0x159   :  { %v1547_v19 = vpop.f32.mrb[13].mxu1  ;;  %v1528_v20 = vpop.f32.mrb[15].mxu0 }
 0x15a   :  { %v991_v21 = vadd.f32 %v1526_v17, %v951_v13  ;;  %v1548_v22 = vadd.f32 %v1547_v19, %v1546_v16  ;;  %v1549_v23 = vpop.f32.mrb[14].mxu1 }
 0x15b   :  { %v1550_v24 = vpop.f32.mrb[15].mxu1 }
 0x15c   :  { %v1031_v25 = vadd.f32 %v1548_v22, %v991_v21 }
 0x15e   :  { %v1036_v26 = vmax.f32 %v1031_v25, 0.0 }
 0x160   :  { %v1037_v27 = vpack.c.bf16 %v1036_v26, %v1036_v26 }
 0x162   :  { %1587 = vmatmul.mubr.bf16.vlgmr.msra.gmra.mrb[16].mxu0 %v1037_v27 }
 0x1f5   :  { %v1240_v28 = vpop.f32.mrb[16].mxu1 }
 0x1f6   :  { %v1608_v29 = vpop.f32.mrb[17].mxu1 }
 0x1f7   :  { %v1243_v31 = vpop.f32.mrb[18].mxu1 }
 0x1f8   :  { %v1609_v32 = vpop.f32.mrb[19].mxu1 }
 0x235   :  { %v1152_v41 = vpop.f32.mrb[16].mxu0 }
 0x236   :  { %v1241_v43 = vadd.f32 %v1240_v28, %v1152_v41  ;;  %v1588_v51 = vpop.f32.mrb[17].mxu0 }
 0x237   :  { %v1155_v54 = vpop.f32.mrb[18].mxu0 }
 0x238   :  { %v1253_v56 = vadd.f32 %v1375_v42, %v1241_v43  ;;  %v1589_v59 = vpop.f32.mrb[19].mxu0 }
 0x23a   :  { %1254 = vst [vmem:[#allocation2] sm:$0xff] %v1253_v56 }
 0x241   :  { %v1272_v60 = vld [vmem:[#allocation2] sm:$0x3] }
 0x242   :  { %1273 = vst [vmem:[%s2310_s7] sm:$0x3] %v1272_v60 }

</bundles_post_ra>
